<compile_context>
chip_gen: v6e
topology: v6e:2x2x1
jax: 0.10.0
libtpu: 0.0.40
codegen_flags: <defaults>
</compile_context>

<pallas_src>
import math

import jax
import jax.numpy as jnp
from jax.experimental import pallas as pl
from jax.experimental.pallas import tpu as pltpu


def _make_kernel(BB, T, hidden, att_dim, r, sharp_beta, compute_dtype):
    def kernel(h1t_ref, mask_ref, w1_ref, w2_ref, m_ref, a_ref):
        x = h1t_ref[...]                                   # [BB, T, hidden] f32
        w1 = w1_ref[...].astype(compute_dtype)             # [hidden, att_dim]
        w2 = w2_ref[...].astype(compute_dtype)             # [att_dim, r]

        # Flatten (BB, T) -> one tall matmul feeding the MXU.
        xm = x.reshape(BB * T, hidden).astype(compute_dtype)
        s = jnp.tanh(
            jnp.dot(xm, w1, preferred_element_type=jnp.float32)
        )                                                  # [BB*T, att_dim] f32
        temp = jnp.dot(
            s.astype(compute_dtype), w2, preferred_element_type=jnp.float32
        )                                                  # [BB*T, r] f32
        temp = temp.reshape(BB, T, r)

        adder = (1.0 - mask_ref[...]) * -10000.0           # [BB, T, 1]
        logits = (temp + adder) * sharp_beta               # broadcast over r
        _at = jax.nn.sigmoid(logits)                       # [BB, T, r] f32
        denom = jnp.sum(_at, axis=1, keepdims=True)        # [BB, 1, r]
        attn = _at * pl.reciprocal(denom, approx=True)     # [BB, T, r]

        # M[b] = H1[b] @ A[b]  ==  X[b]^T @ A[b]  (contract the T dims).
        m = jnp.einsum(
            "bth,btr->bhr",
            x.astype(compute_dtype),
            attn.astype(compute_dtype),
            preferred_element_type=jnp.float32,
        )                                                  # [BB, hidden, r]

        m_ref[...] = m.astype(m_ref.dtype)
        a_ref[...] = attn.astype(a_ref.dtype)

    return kernel


def attention_mask_forward(H, W1, W2, *, sharp_beta=1.0, block_b=8,
                           use_bf16=True):
    """H: [B, hidden+1, T] f32. Returns (M [B, hidden, r], A [B, T, r])."""
    H = jnp.asarray(H, jnp.float32)
    W1 = jnp.asarray(W1, jnp.float32)
    W2 = jnp.asarray(W2, jnp.float32)

    B, hp1, T = H.shape
    hidden = hp1 - 1
    att_dim, r = W2.shape
    assert W1.shape == (hidden, att_dim)

    # Wrapper-side layout plumbing (cheap XLA ops on HBM-resident data):
    # split features from the mask row and put T on the sublane axis so the
    # kernel can flatten (BB, T) without any in-kernel transpose.
    H1t = jnp.transpose(H[:, :hidden, :], (0, 2, 1))        # [B, T, hidden]
    mask = jnp.transpose(H[:, hidden:, :], (0, 2, 1))       # [B, T, 1]

    # Batch block size: as large as practical, capped by a VMEM budget for the
    # (double-buffered) feature block.
    h_block_bytes = T * hidden * 4
    bb_cap = max(1, (8 * 1024 * 1024) // max(1, 2 * h_block_bytes))
    BB = max(1, min(block_b, B, bb_cap))

    # Pad B up to a multiple of BB (padded batches get mask=1 to avoid 0/0;
    # their outputs are sliced away below).
    Bp = ((B + BB - 1) // BB) * BB
    if Bp != B:
        pad = Bp - B
        H1t = jnp.pad(H1t, ((0, pad), (0, 0), (0, 0)))
        mask = jnp.pad(mask, ((0, pad), (0, 0), (0, 0)), constant_values=1.0)

    compute_dtype = jnp.bfloat16 if use_bf16 else jnp.float32
    kernel = _make_kernel(BB, T, hidden, att_dim, r, float(sharp_beta),
                          compute_dtype)

    # Explicit VMEM budget (headroom under v7x's 64 MiB physical).
    block_bytes = (
        2 * (BB * T * hidden + BB * T) * 4          # double-buffered inputs
        + 2 * (BB * hidden * r + BB * T * r) * 4    # double-buffered outputs
        + (hidden * att_dim + att_dim * r) * 4      # resident weights
    )
    vmem_limit = int(min(max(4 * block_bytes, 32 * 1024 * 1024),
                         48 * 1024 * 1024))

    grid_spec = pltpu.PrefetchScalarGridSpec(
        num_scalar_prefetch=0,
        grid=(Bp // BB,),
        in_specs=[
            pl.BlockSpec((BB, T, hidden), lambda i: (i, 0, 0)),   # H1^T block
            pl.BlockSpec((BB, T, 1), lambda i: (i, 0, 0)),        # mask block
            pl.BlockSpec((hidden, att_dim), lambda i: (0, 0)),    # W1 (full)
            pl.BlockSpec((att_dim, r), lambda i: (0, 0)),         # W2 (full)
        ],
        out_specs=[
            pl.BlockSpec((BB, hidden, r), lambda i: (i, 0, 0)),   # M block
            pl.BlockSpec((BB, T, r), lambda i: (i, 0, 0)),        # A block
        ],
    )

    out_shapes = (
        jax.ShapeDtypeStruct((Bp, hidden, r), jnp.float32),
        jax.ShapeDtypeStruct((Bp, T, r), jnp.float32),
    )

    M, A = pl.pallas_call(
        kernel,
        out_shape=out_shapes,
        grid_spec=grid_spec,
        compiler_params=pltpu.CompilerParams(
            dimension_semantics=("parallel",),
            vmem_limit_bytes=vmem_limit,
        ),
    )(H1t, mask, W1, W2)

    if Bp != B:
        M = M[:B]
        A = A[:B]
    return M, A


def _xavier_uniform(key, shape):
    fan_in, fan_out = shape
    bound = math.sqrt(6.0 / (fan_in + fan_out))
    return jax.random.uniform(key, shape, dtype=jnp.float32,
                              minval=-bound, maxval=bound)


def _reference(H, W1, W2, sharp_beta=1.0):
    hidden = W1.shape[0]
    H1 = H[:, :hidden, :]                                  # [B, hidden, T]
    mask = H[:, hidden, :]                                 # [B, T]
    Ht = jnp.tanh(jnp.einsum("bdt,da->bta", H1, W1))       # [B, T, att_dim]
    temp = jnp.einsum("bta,ar->btr", Ht, W2)               # [B, T, r]
    adder = (1.0 - mask) * -10000.0
    temp = temp + adder[:, :, None]
    _at = jax.nn.sigmoid(temp * sharp_beta)
    A = _at / jnp.sum(_at, axis=1, keepdims=True)
    M = jnp.einsum("bdt,btr->bdr", H1, A)
    return M, A


if __name__ == "__main__":
    # Small deterministic config.
    B, hidden, att_dim, r, T = 2, 32, 16, 8, 16
    sharp_beta = 1.0

    key = jax.random.PRNGKey(0)
    k_h, k_w1, k_w2, k_mask = jax.random.split(key, 4)

    # Features + binary mask row stacked as in the PyTorch usage.
    feats = jax.random.normal(k_h, (B, hidden, T), dtype=jnp.float32)
    mask = (jax.random.uniform(k_mask, (B, 1, T)) > 0.25).astype(jnp.float32)
    H = jnp.concatenate([feats, mask], axis=1)             # [B, hidden+1, T]

    W1 = _xavier_uniform(k_w1, (hidden, att_dim))
    W2 = _xavier_uniform(k_w2, (att_dim, r))

    M_ref, A_ref = _reference(H, W1, W2, sharp_beta)

    # f32 matmul path: tight check of the kernel structure.
    M32, A32 = attention_mask_forward(H, W1, W2, sharp_beta=sharp_beta,
                                      use_bf16=False)
    M32, A32 = jax.block_until_ready((M32, A32))
    assert jnp.allclose(M32, M_ref, atol=5e-3, rtol=5e-3)
    assert jnp.allclose(A32, A_ref, atol=5e-3, rtol=5e-3)

    # bf16-operand / f32-accumulate path (default, per perf review) — looser
    # tolerances as anticipated by the review.
    M, A = attention_mask_forward(H, W1, W2, sharp_beta=sharp_beta,
                                  use_bf16=True)
    M, A = jax.block_until_ready((M, A))
    assert jnp.allclose(M, M_ref, atol=5e-2, rtol=5e-2)
    assert jnp.allclose(A, A_ref, atol=1.5e-2, rtol=1.5e-2)

    print("KERNEL_OK")
</pallas_src>

<mosaic_0001>
module attributes {stable_mosaic.version = 11 : i64} {
  func.func @kernel(%arg0: i32, %arg1: memref<2x16x32xf32, #tpu.memory_space<vmem>>, %arg2: memref<2x16x1xf32, #tpu.memory_space<vmem>>, %arg3: memref<32x16xf32, #tpu.memory_space<vmem>>, %arg4: memref<16x8xf32, #tpu.memory_space<vmem>>, %arg5: memref<2x32x8xf32, #tpu.memory_space<vmem>>, %arg6: memref<2x16x8xf32, #tpu.memory_space<vmem>>) attributes {dimension_semantics = [#tpu.dimension_semantics<parallel>], iteration_bounds = array<i64: 1>, scalar_prefetch = 0 : i64, scratch_operands = 0 : i64, tpu.core_type = #tpu.core_type<tc>, window_params = [{transform_indices = @transform_0, window_bounds = array<i64: 2, 16, 32>}, {transform_indices = @transform_1, window_bounds = array<i64: 2, 16, 1>}, {pipeline_mode = #tpu.pipeline_mode<synchronous>, transform_indices = @transform_2, window_bounds = array<i64: 32, 16>}, {pipeline_mode = #tpu.pipeline_mode<synchronous>, transform_indices = @transform_3, window_bounds = array<i64: 16, 8>}, {transform_indices = @transform_4, window_bounds = array<i64: 2, 32, 8>}, {transform_indices = @transform_5, window_bounds = array<i64: 2, 16, 8>}]} {
    %c0 = arith.constant 0 : index
    %c0_0 = arith.constant 0 : index
    %c0_1 = arith.constant 0 : index
    %0 = vector.load %arg1[%c0, %c0_0, %c0_1] : memref<2x16x32xf32, #tpu.memory_space<vmem>>, vector<2x16x32xf32>
    %c0_2 = arith.constant 0 : index
    %c0_3 = arith.constant 0 : index
    %1 = vector.load %arg3[%c0_2, %c0_3] : memref<32x16xf32, #tpu.memory_space<vmem>>, vector<32x16xf32>
    %c0_4 = arith.constant 0 : index
    %c0_5 = arith.constant 0 : index
    %2 = vector.load %arg4[%c0_4, %c0_5] : memref<16x8xf32, #tpu.memory_space<vmem>>, vector<16x8xf32>
    %3 = vector.shape_cast %0 : vector<2x16x32xf32> to vector<32x32xf32>
    %cst = arith.constant dense<0.000000e+00> : vector<32x16xf32>
    %4 = tpu.matmul %3, %1, %cst {dimension_numbers = #tpu.dot_dimension_numbers<[1], [0], [0], [1], [0, 0, 1, 1], [], []>} : vector<32x32xf32>, vector<32x16xf32>, vector<32x16xf32> -> vector<32x16xf32>
    %5 = math.tanh %4 : vector<32x16xf32>
    %cst_6 = arith.constant dense<0.000000e+00> : vector<32x8xf32>
    %6 = tpu.matmul %5, %2, %cst_6 {dimension_numbers = #tpu.dot_dimension_numbers<[1], [0], [0], [1], [0, 0, 1, 1], [], []>} : vector<32x16xf32>, vector<16x8xf32>, vector<32x8xf32> -> vector<32x8xf32>
    %7 = vector.shape_cast %6 : vector<32x8xf32> to vector<2x16x8xf32>
    %c0_7 = arith.constant 0 : index
    %c0_8 = arith.constant 0 : index
    %c0_9 = arith.constant 0 : index
    %8 = vector.load %arg2[%c0_7, %c0_8, %c0_9] : memref<2x16x1xf32, #tpu.memory_space<vmem>>, vector<2x16x1xf32>
    %cst_10 = arith.constant 1.000000e+00 : f32
    %9 = vector.broadcast %cst_10 : f32 to vector<2x16x1xf32>
    %10 = arith.subf %9, %8 : vector<2x16x1xf32>
    %cst_11 = arith.constant -1.000000e+04 : f32
    %11 = vector.broadcast %cst_11 : f32 to vector<2x16x1xf32>
    %12 = arith.mulf %10, %11 : vector<2x16x1xf32>
    %13 = vector.broadcast %12 : vector<2x16x1xf32> to vector<2x16x8xf32>
    %14 = arith.addf %7, %13 : vector<2x16x8xf32>
    %cst_12 = arith.constant 1.000000e+00 : f32
    %15 = vector.broadcast %cst_12 : f32 to vector<2x16x8xf32>
    %16 = arith.mulf %14, %15 : vector<2x16x8xf32>
    %17 = arith.negf %16 : vector<2x16x8xf32>
    %18 = math.exp %17 : vector<2x16x8xf32>
    %cst_13 = arith.constant 1.000000e+00 : f32
    %19 = vector.broadcast %cst_13 : f32 to vector<2x16x8xf32>
    %20 = arith.addf %19, %18 : vector<2x16x8xf32>
    %21 = arith.divf %19, %20 : vector<2x16x8xf32>
    %cst_14 = arith.constant dense<0.000000e+00> : vector<2x8xf32>
    %22 = vector.multi_reduction <add>, %21, %cst_14 [1] : vector<2x16x8xf32> to vector<2x8xf32>
    %23 = vector.shape_cast %22 : vector<2x8xf32> to vector<2x1x8xf32>
    %24 = tpu.reciprocal %23 {approx = true} : vector<2x1x8xf32> -> vector<2x1x8xf32>
    %25 = vector.broadcast %24 : vector<2x1x8xf32> to vector<2x16x8xf32>
    %26 = arith.mulf %21, %25 : vector<2x16x8xf32>
    "tpu.trace_start"() <{level = 10 : i32, message = "bth,btr->bhr"}> : () -> ()
    %cst_15 = arith.constant dense<0.000000e+00> : vector<2x32x8xf32>
    %27 = tpu.matmul %0, %26, %cst_15 {dimension_numbers = #tpu.dot_dimension_numbers<[1], [1], [2], [2], [0, 0, 0, 2, 1, 2], [0], [0]>} : vector<2x16x32xf32>, vector<2x16x8xf32>, vector<2x32x8xf32> -> vector<2x32x8xf32>
    "tpu.trace_stop"() : () -> ()
    %c0_16 = arith.constant 0 : index
    %c0_17 = arith.constant 0 : index
    %c0_18 = arith.constant 0 : index
    %28 = vector.load %arg5[%c0_16, %c0_17, %c0_18] : memref<2x32x8xf32, #tpu.memory_space<vmem>>, vector<2x32x8xf32>
    tpu.vector_store %arg5[%c0_16, %c0_17, %c0_18], %27 {strides = array<i32>} : memref<2x32x8xf32, #tpu.memory_space<vmem>>, vector<2x32x8xf32>,
    %c0_19 = arith.constant 0 : index
    %c0_20 = arith.constant 0 : index
    %c0_21 = arith.constant 0 : index
    %29 = vector.load %arg6[%c0_19, %c0_20, %c0_21] : memref<2x16x8xf32, #tpu.memory_space<vmem>>, vector<2x16x8xf32>
    tpu.vector_store %arg6[%c0_19, %c0_20, %c0_21], %26 {strides = array<i32>} : memref<2x16x8xf32, #tpu.memory_space<vmem>>, vector<2x16x8xf32>,
    return
  }
  func.func @transform_0(%arg0: i32) -> (i32, i32, i32) {
    %c0_i32 = arith.constant 0 : i32
    %c0_i32_0 = arith.constant 0 : i32
    %c0_i32_1 = arith.constant 0 : i32
    return %arg0, %c0_i32, %c0_i32_0 : i32, i32, i32
  }
  func.func @transform_1(%arg0: i32) -> (i32, i32, i32) {
    %c0_i32 = arith.constant 0 : i32
    %c0_i32_0 = arith.constant 0 : i32
    %c0_i32_1 = arith.constant 0 : i32
    return %arg0, %c0_i32, %c0_i32_0 : i32, i32, i32
  }
  func.func @transform_2(%arg0: i32) -> (i32, i32) {
    %c0_i32 = arith.constant 0 : i32
    %c0_i32_0 = arith.constant 0 : i32
    %c0_i32_1 = arith.constant 0 : i32
    return %c0_i32, %c0_i32_0 : i32, i32
  }
  func.func @transform_3(%arg0: i32) -> (i32, i32) {
    %c0_i32 = arith.constant 0 : i32
    %c0_i32_0 = arith.constant 0 : i32
    %c0_i32_1 = arith.constant 0 : i32
    return %c0_i32, %c0_i32_0 : i32, i32
  }
  func.func @transform_4(%arg0: i32) -> (i32, i32, i32) {
    %c0_i32 = arith.constant 0 : i32
    %c0_i32_0 = arith.constant 0 : i32
    %c0_i32_1 = arith.constant 0 : i32
    return %arg0, %c0_i32, %c0_i32_0 : i32, i32, i32
  }
  func.func @transform_5(%arg0: i32) -> (i32, i32, i32) {
    %c0_i32 = arith.constant 0 : i32
    %c0_i32_0 = arith.constant 0 : i32
    %c0_i32_1 = arith.constant 0 : i32
    return %arg0, %c0_i32, %c0_i32_0 : i32, i32, i32
  }
}

</mosaic_0001>

<bundles_post_ra>
// kernel: tpu_custom_call.1
= control target key start
LH: loop header
LB: loop body
LE: loop exit
PB: predicated region body
PF: predicated region fallthrough
CT: control target
= control target key end

     0   :  { %vm29_vm0 = vcmask 261120   ;;  %v714_v10 = vmov 0   ;;  %vm131_vm1 = vcmask 130048   ;;  %vm289_vm2 = vcmask 64512   ;;  %s855_s2 = inlined_call_operand.vmem [shape: f32[32,16], index: 2, kind: input, shape index: {}]   ;;  %s856_s0 = inlined_call_operand.vmem [shape: f32[2,16,32], index: 0, kind: input, shape index: {}]   ;;  %s857_s3 = inlined_call_operand.vmem [shape: f32[16,8], index: 3, kind: input, shape index: {}]   ;;  %s858_s1 = inlined_call_operand.vmem [shape: f32[2,16,1], index: 1, kind: input, shape index: {}]   ;;  %s859_s5 = inlined_call_operand.vmem [shape: f32[2,16,8], index: 5, kind: output, shape index: {1}]   ;;  %s860_s4 = inlined_call_operand.vmem [shape: f32[2,32,8], index: 4, kind: output, shape index: {0}]  }
   0x1   :  { %v26_v0 = vld [vmem:[%s855_s2 + $0x18] sm:$0xff]  ;;  %v25_v1 = vld [vmem:[%s855_s2 + $0x10] sm:$0xff]  ;;  %v19_v2 = vld [vmem:[%s856_s0] sm:$0xff]  ;;  %684 = vset.pattern.permute.xlu0 %v714_v10  ;;  %685 = vset.pattern.permute.xlu1 %v714_v10 }
   0x2   :  { %638 = vmatprep.subr.mxu0 %v26_v0  ;;  %v24_v3 = vld [vmem:[%s855_s2 + $0x8] sm:$0xff]  ;;  %646 = vmatprep.mubr.msk.f32.mxu0 %vm29_vm0, %v19_v2  ;;  %v23_v4 = vld [vmem:[%s855_s2] sm:$0xff]  ;;  %v21_v6 = vld [vmem:[%s856_s0 + $0x10] sm:$0xff] }
   0x3   :  { %639 = vmatpush3.msra.mxu0 %v26_v0  ;;  %v20_v5 = vld [vmem:[%s856_s0 + $0x8] sm:$0xff]  ;;  %v22_v7 = vld [vmem:[%s856_s0 + $0x18] sm:$0xff]  ;;  %v27_v9 = vld [vmem:[%s857_s3] sm:$0xff] }
   0x4   :  { %640 = vmatprep.subr.mxu0 %v25_v1  ;;  %v28_v8 = vld [vmem:[%s857_s3 + $0x8] sm:$0xff]  ;;  %v229_v11 = vld [vmem:[%s858_s1] sm:$0xff]  ;;  %v231_v12 = vld [vmem:[%s858_s1 + $0x10] sm:$0xff] }
   0x5   :  { %641 = vmatpush3.msra.mxu0 %v25_v1  ;;  %652 = vmatprep.subr.mxu1 %v28_v8  ;;  %v230_v13 = vld [vmem:[%s858_s1 + $0x8] sm:$0xff]  ;;  %v233_v14 = vsub.f32 1.0, %v229_v11  ;;  %v235_v15 = vsub.f32 1.0, %v231_v12  ;;  %v232_v17 = vld [vmem:[%s858_s1 + $0x18] sm:$0xff] }
   0x6   :  { %642 = vmatprep.subr.mxu0 %v24_v3  ;;  %653 = vmatpush3.msra.mxu1 %v28_v8  ;;  %v234_v16 = vsub.f32 1.0, %v230_v13  ;;  %v236_v18 = vsub.f32 1.0, %v232_v17 }
   0x7   :  { %643 = vmatpush3.msra.mxu0 %v24_v3  ;;  %654 = vmatprep.subr.mxu1 %v27_v9  ;;  %v237_v19 = vmul.f32 -10000.0, %v233_v14  ;;  %v239_v20 = vmul.f32 -10000.0, %v235_v15 }
   0x8   :  { %644 = vmatprep.subr.mxu0 %v23_v4  ;;  %655 = vmatpush3.msra.mxu1 %v27_v9  ;;  %v238_v21 = vmul.f32 -10000.0, %v234_v16  ;;  %v240_v22 = vmul.f32 -10000.0, %v236_v18 }
   0x9   :  { %645 = vmatpush3.msra.mxu0 %v23_v4  ;;  %243 = vperm.xlu0 %684, %v237_v19  }
   0xa   :  { %647 = vmatmul.mubr.msk.f32.vlgmr.msra.gmra.mxu0 %vm29_vm0, %v20_v5  ;;  %253 = vperm.xlu1 %685, %v239_v20  }
   0xb   :  { %649 = vmatprep.mubr.msk.f32.mxu0 %vm29_vm0, %v21_v6 }
   0xd   :  { %248 = vperm.xlu0 %684, %v238_v21  }
   0xe   :  { %650 = vmatmul.mubr.msk.f32.gmra.mxu0 %vm29_vm0, %v22_v7  ;;  %258 = vperm.xlu1 %685, %v240_v22  }
  0x2b   :  { %314 = vxpose.xlu0.b32.start [1/2] (short) (narrow) %v19_v2, 32 }
  0x2f   :  { %315 = vxpose.xlu0.b32.end [2/2] (short) (narrow) %v20_v5, 32 }
  0x37   :  { %443 = vxpose.xlu1.b32.start [1/2] (short) (narrow) %v21_v6, 32 }
  0x3b   :  { %444 = vxpose.xlu1.b32.end [2/2] (short) (narrow) %v22_v7, 32 }
  0x84   :  { %v244_v31 = vpop.permute.xlu0 %243 }
  0x85   :  { %v254_v32 = vpop.permute.xlu1 %253 }
  0x88   :  { %v249_v33 = vpop.permute.xlu0 %248 }
  0x89   :  { %v259_v34 = vpop.permute.xlu1 %258 }
  0xa7   :  { %v330_v35 = vpop.trf.xlu0 }
  0xab   :  { %v331_v15 = vpop.trf.xlu0 }
  0xaf   :  { %v332_v20 = vpop.trf.xlu0 }
  0xb3   :  { %v459_v36 = vpop.trf.xlu1 }
  0xb4   :  { %676 = vmatprep.mubr.msk.f32.mxu0 %vm131_vm1, %v459_v36 }
  0xb7   :  { %v460_v17 = vpop.trf.xlu1 }
  0xca   :  { %v648_v23 = vpop.f32.mrf.mxu0 }
  0xcc   :  { %v108_v24 = vpop.f32.mrf.mxu0 }
  0xcd   :  { %686 = vtanh.f32 %v108_v24  ;;  %v461_v24 = vpop.trf.xlu1 }
  0xce   :  { %688 = vtanh.f32 %v648_v23  ;;  %v651_v25 = vpop.f32.mrf.mxu0 }
  0xd0   :  { %v118_v26 = vpop.f32.mrf.mxu0 }
  0xd1   :  { %690 = vtanh.f32 %v118_v26  ;;  %v462_v26 = vpop.trf.xlu1 }
  0xd2   :  { %692 = vtanh.f32 %v651_v25  ;;  %v333_v25 = vpop.trf.xlu0 }
  0xda   :  { %v687_v27 = vpop.eup %686 }
  0xdb   :  { %v689_v28 = vpop.eup %688  ;;  %656 = vmatprep.mubr.msk.f32.mxu1 %vm131_vm1, %v687_v27 }
  0xdc   :  { %657 = vmatmul.mubr.msk.f32.vlgmr.msra.gmra.mxu1 %vm131_vm1, %v689_v28 }
  0xde   :  { %v691_v29 = vpop.eup %690 }
  0xdf   :  { %v693_v30 = vpop.eup %692  ;;  %659 = vmatprep.mubr.msk.f32.mxu1 %vm131_vm1, %v691_v29 }
  0xe0   :  { %660 = vmatmul.mubr.msk.f32.gmra.mxu1 %vm131_vm1, %v693_v30 }
  0xe1   :  { %666 = vmatprep.mubr.msk.f32.mxu1 %vm131_vm1, %v330_v35 }
 0x19c   :  { %v658_v37 = vpop.f32.mrf.mxu1 }
 0x19d   :  { %v262_v38 = vadd.f32 %v658_v37, %v249_v33 }
 0x19e   :  { %v210_v39 = vpop.f32.mrf.mxu1 }
 0x19f   :  { %v601_v40 = vmul.f32 -1.442695, %v262_v38  ;;  %v261_v41 = vadd.f32 %v244_v31, %v210_v39 }
 0x1a0   :  { %v661_v42 = vpop.f32.mrf.mxu1 }
 0x1a1   :  { %694 = vpow2.f32 %v601_v40  ;;  %v600_v43 = vmul.f32 -1.442695, %v261_v41  ;;  %v264_v44 = vadd.f32 %v661_v42, %v259_v34 }
 0x1a2   :  { %v220_v45 = vpop.f32.mrf.mxu1 }
 0x1a3   :  { %696 = vpow2.f32 %v600_v43  ;;  %v603_v46 = vmul.f32 -1.442695, %v264_v44  ;;  %v263_v47 = vadd.f32 %v254_v32, %v220_v45 }
 0x1a5   :  { %698 = vpow2.f32 %v603_v46  ;;  %v602_v48 = vmul.f32 -1.442695, %v263_v47 }
 0x1a7   :  { %700 = vpow2.f32 %v602_v48 }
 0x1ae   :  { %v695_v49 = vpop.eup %694 }
 0x1af   :  { %v278_v50 = vadd.f32 1.0, %v695_v49 }
 0x1b0   :  { %v697_v51 = vpop.eup %696 }
 0x1b1   :  { %702 = vrcp.f32 %v278_v50  ;;  %v277_v52 = vadd.f32 1.0, %v697_v51 }
 0x1b2   :  { %v699_v53 = vpop.eup %698 }
 0x1b3   :  { %704 = vrcp.f32 %v277_v52  ;;  %v280_v54 = vadd.f32 1.0, %v699_v53 }
 0x1b4   :  { %v701_v55 = vpop.eup %700 }
 0x1b5   :  { %706 = vrcp.f32 %v280_v54  ;;  %v279_v56 = vadd.f32 1.0, %v701_v55 }
 0x1b7   :  { %708 = vrcp.f32 %v279_v56 }
 0x1be   :  { %v703_v57 = vpop.eup %702 }
 0x1bf   :  { %v291_v59 = vsel %vm289_vm2, %v703_v57, 0.0 }
 0x1c0   :  { %v705_v58 = vpop.eup %704 }
 0x1c1   :  { %v290_v60 = vsel %vm289_vm2, %v705_v58, 0.0 }
 0x1c2   :  { %v707_v61 = vpop.eup %706  ;;  %v292_v62 = vadd.f32 %v291_v59, %v290_v60 }
 0x1c3   :  { %v300_v1 = vsel %vm289_vm2, %v707_v61, 0.0 }
 0x1c4   :  { %v709_v63 = vpop.eup %708  ;;  %v293_v0 = vrot.slane %v292_v62, 4 }
 0x1c5   :  { %v299_v2 = vsel %vm289_vm2, %v709_v63, 0.0 }
 0x1c6   :  { %v301_v3 = vadd.f32 %v300_v1, %v299_v2  ;;  %v294_v4 = vadd.f32 %v293_v0, %v292_v62 }
 0x1c8   :  { %v302_v5 = vrot.slane %v301_v3, 4  ;;  %v295_v6 = vrot.slane %v294_v4, 2 }
 0x1ca   :  { %v296_v7 = vadd.f32 %v295_v6, %v294_v4  ;;  %v303_v8 = vadd.f32 %v302_v5, %v301_v3 }
 0x1cc   :  { %v297_v9 = vrot.slane %v296_v7, 1  ;;  %v304_v10 = vrot.slane %v303_v8, 2 }
 0x1ce   :  { %v298_v11 = vadd.f32 %v297_v9, %v296_v7  ;;  %v305_v12 = vadd.f32 %v304_v10, %v303_v8 }
 0x1d0   :  { %710 = vrcp.f32 %v298_v11  ;;  %v306_v13 = vrot.slane %v305_v12, 1 }
 0x1d2   :  { %v307_v14 = vadd.f32 %v306_v13, %v305_v12 }
 0x1d4   :  { %712 = vrcp.f32 %v307_v14 }
 0x1dd   :  { %v711_v16 = vpop.eup %710 }
 0x1de   :  { %v311_v18 = vmul.f32 %v711_v16, %v703_v57  ;;  %v310_v19 = vmul.f32 %v711_v16, %v705_v58 }
 0x1e0   :  { %662 = vmatprep.subr.mxu1 %v311_v18  ;;  %581 = vst.msk [vmem:[%s859_s5 + $0x8] sm:$0xff] %vm289_vm2, %v311_v18  ;;  %580 = vst.msk [vmem:[%s859_s5] sm:$0xff] %vm289_vm2, %v310_v19 }
 0x1e1   :  { %v713_v21 = vpop.eup %712  ;;  %663 = vmatpush3.msra.mxu1 %v311_v18 }
 0x1e2   :  { %664 = vmatprep.subr.mxu1 %v310_v19  ;;  %v313_v22 = vmul.f32 %v713_v21, %v707_v61  ;;  %v312_v23 = vmul.f32 %v713_v21, %v709_v63 }
 0x1e3   :  { %665 = vmatpush3.msra.mxu1 %v310_v19 }
 0x1e4   :  { %672 = vmatprep.subr.mxu0 %v313_v22  ;;  %583 = vst.msk [vmem:[%s859_s5 + $0x18] sm:$0xff] %vm289_vm2, %v313_v22  ;;  %582 = vst.msk [vmem:[%s859_s5 + $0x10] sm:$0xff] %vm289_vm2, %v312_v23  ;;  %667 = vmatmul.mubr.msk.f32.vlgmr.msra.gmra.mxu1 %vm131_vm1, %v331_v15 }
 0x1e5   :  { %673 = vmatpush3.msra.mxu0 %v313_v22  ;;  %669 = vmatprep.mubr.msk.f32.mxu1 %vm131_vm1, %v332_v20 }
 0x1e6   :  { %674 = vmatprep.subr.mxu0 %v312_v23 }
 0x1e7   :  { %675 = vmatpush3.msra.mxu0 %v312_v23 }
 0x1e8   :  { %677 = vmatmul.mubr.msk.f32.vlgmr.msra.gmra.mxu0 %vm131_vm1, %v460_v17  ;;  %670 = vmatmul.mubr.msk.f32.gmra.mxu1 %vm131_vm1, %v333_v25 }
 0x1e9   :  { %679 = vmatprep.mubr.msk.f32.mxu0 %vm131_vm1, %v461_v24 }
 0x1ec   :  { %680 = vmatmul.mubr.msk.f32.gmra.mxu0 %vm131_vm1, %v462_v26 }
 0x2a4   :  { %v668_v27 = vpop.f32.mrf.mxu1 }
 0x2a5   :  { %573 = vst.msk [vmem:[%s860_s4 + $0x8] sm:$0xff] %vm289_vm2, %v668_v27 }
 0x2a6   :  { %v424_v28 = vpop.f32.mrf.mxu1 }
 0x2a7   :  { %572 = vst.msk [vmem:[%s860_s4] sm:$0xff] %vm289_vm2, %v424_v28 }
 0x2a8   :  { %v678_v29 = vpop.f32.mrf.mxu0  ;;  %v671_v30 = vpop.f32.mrf.mxu1 }
 0x2a9   :  { %577 = vst.msk [vmem:[%s860_s4 + $0x28] sm:$0xff] %vm289_vm2, %v678_v29  ;;  %575 = vst.msk [vmem:[%s860_s4 + $0x18] sm:$0xff] %vm289_vm2, %v671_v30 }
 0x2aa   :  { %v553_v31 = vpop.f32.mrf.mxu0  ;;  %v434_v32 = vpop.f32.mrf.mxu1 }
 0x2ab   :  { %576 = vst.msk [vmem:[%s860_s4 + $0x20] sm:$0xff] %vm289_vm2, %v553_v31  ;;  %574 = vst.msk [vmem:[%s860_s4 + $0x10] sm:$0xff] %vm289_vm2, %v434_v32 }
 0x2ac   :  { %v681_v33 = vpop.f32.mrf.mxu0 }
 0x2ad   :  { %579 = vst.msk [vmem:[%s860_s4 + $0x38] sm:$0xff] %vm289_vm2, %v681_v33 }
 0x2ae   :  { %v563_v34 = vpop.f32.mrf.mxu0 }
 0x2af   :  { %578 = vst.msk [vmem:[%s860_s4 + $0x30] sm:$0xff] %vm289_vm2, %v563_v34 }

</bundles_post_ra>
